<compile_context>
chip_gen: v7x
topology: tpu7x:2x2x1
jax: 0.10.0
libtpu: 0.0.40
codegen_flags: <defaults>
</compile_context>

<pallas_src>
import functools
import math

import jax
import jax.numpy as jnp
from jax.experimental import pallas as pl
from jax.experimental.pallas import tpu as pltpu


def actor_kernel(x_ref, w_ref, o_ref):
    # x_ref : (n_in, TB)                      feature-major activations
    # w_ref : (F+1, (n_in+1) + (F+1) + n_out) packed params:
    #           cols [0, n_in]        rows [0, F)  -> [W1 | b1]
    #           cols [n_in+1, n_in+F+1] rows [0, F) -> [W2 | b2]
    #           cols [n_in+F+2, ...)  rows [0, F]  -> [W3^T ; b3]
    # o_ref : (n_out, TB)
    x = x_ref[...]
    W = w_ref[...]
    n_in = x.shape[0]
    n_out = o_ref.shape[0]
    F_ = W.shape[0] - 1
    c1 = n_in + 1
    c2 = c1 + F_ + 1

    w1 = W[:F_, 0:c1]          # (F, n_in+1), last column = bias
    w2 = W[:F_, c1:c2]         # (F, F+1),    last column = bias
    w3 = W[:, c2:]             # (F+1, n_out), last row    = bias

    # ---- Layer 1 on the VPU: K = n_in broadcast multiply-adds (skips MXU
    # fill/drain for a matmul that would be >97% zero padding).
    h = w1[:, n_in:n_in + 1]                      # bias column (F, 1)
    for k in range(n_in):                         # static, unrolled at trace time
        h = h + w1[:, k:k + 1] * x[k:k + 1, :]    # (F,1)*(1,TB) -> (F,TB)
    h1 = jnp.maximum(h, 0.0)                      # F.relu

    # ---- Layer 2 on the MXU (F x F is the only non-degenerate matmul).
    h2 = jnp.dot(w2[:, :F_], h1, preferred_element_type=jnp.float32) + w2[:, F_:]
    h2 = jnp.maximum(h2, 0.0)                     # F.relu

    # ---- Layer 3.
    if n_out == 1:
        # VPU multiply + cross-sublane (XLU) reduce instead of a nearly-empty
        # MXU push + result-FIFO pop.
        a = jnp.sum(w3[:F_, :] * h2, axis=0, keepdims=True) + w3[F_:, :]
    else:
        a = (jnp.dot(w3[:F_, :].T, h2, preferred_element_type=jnp.float32)
             + w3[F_:, :].T)
    o_ref[...] = a.astype(o_ref.dtype)


@functools.partial(jax.jit, static_argnames=("batch_block",))
def actor_forward(state, w_packed, *, batch_block=512):
    """state: (B, 1, n_input), like the PyTorch module. Returns (B, n_output)."""
    n_in = state.shape[-1]
    F = w_packed.shape[0] - 1
    n_out = w_packed.shape[1] - (n_in + 1) - (F + 1)

    B = state.shape[0]
    x = state.reshape(B, n_in).astype(jnp.float32)   # torch.squeeze(state, 1).float()
    x_fm = x.T                                       # (n_in, B): batch on lane axis

    if B <= batch_block:
        TB, Bp = B, B                                # single full-array block
    else:
        assert batch_block % 128 == 0, "batch_block must be a multiple of 128"
        TB = batch_block
        Bp = pl.cdiv(B, TB) * TB
        x_fm = jnp.pad(x_fm, ((0, 0), (0, Bp - B)))
    grid = (Bp // TB,)

    flops = 2 * B * (n_in * F + F * F + F * n_out)
    bytes_accessed = 4 * (n_in * Bp + w_packed.size + n_out * Bp)

    out_fm = pl.pallas_call(
        actor_kernel,
        out_shape=jax.ShapeDtypeStruct((n_out, Bp), jnp.float32),
        grid_spec=pltpu.PrefetchScalarGridSpec(
            num_scalar_prefetch=0,
            grid=grid,
            in_specs=[
                pl.BlockSpec((n_in, TB), lambda i: (0, i)),
                # Packed weights: constant block index -> stay VMEM-resident
                # across the batch grid (no per-step re-fetch).
                pl.BlockSpec(w_packed.shape, lambda i: (0, 0)),
            ],
            out_specs=pl.BlockSpec((n_out, TB), lambda i: (0, i)),
        ),
        compiler_params=pltpu.CompilerParams(
            dimension_semantics=("parallel",)),
        cost_estimate=pl.CostEstimate(
            flops=int(flops), transcendentals=0,
            bytes_accessed=int(bytes_accessed)),
    )(x_fm, w_packed)

    return out_fm[:, :B].T                            # back to (B, n_out)


def _xavier_uniform(key, out_f, in_f, gain):
    # nn.init.xavier_uniform_ on a (out, in) weight.
    bound = gain * math.sqrt(6.0 / (in_f + out_f))
    return jax.random.uniform(key, (out_f, in_f), minval=-bound, maxval=bound,
                              dtype=jnp.float32)


def _default_bias(key, out_f, in_f):
    # PyTorch nn.Linear default bias init: U(-1/sqrt(fan_in), 1/sqrt(fan_in)).
    bound = 1.0 / math.sqrt(in_f)
    return jax.random.uniform(key, (out_f, 1), minval=-bound, maxval=bound,
                              dtype=jnp.float32)


def init_actor_params(key, n_input, n_features, n_output):
    """Returns a single packed (F+1, n_in+1 + F+1 + n_out) parameter buffer."""
    k = jax.random.split(key, 6)
    relu_gain = math.sqrt(2.0)     # calculate_gain('relu')
    lin_gain = 1.0                 # calculate_gain('linear')
    w1 = _xavier_uniform(k[0], n_features, n_input, relu_gain)
    b1 = _default_bias(k[1], n_features, n_input)
    w2 = _xavier_uniform(k[2], n_features, n_features, relu_gain)
    b2 = _default_bias(k[3], n_features, n_features)
    w3 = _xavier_uniform(k[4], n_output, n_features, lin_gain)
    b3 = _default_bias(k[5], n_output, n_features)

    w1a = jnp.concatenate([w1, b1], axis=1)           # (F, n_in + 1)
    w2a = jnp.concatenate([w2, b2], axis=1)           # (F, F + 1)
    w3a = jnp.concatenate([w3.T, b3.T], axis=0)       # (F + 1, n_out)
    top = jnp.concatenate([w1a, w2a], axis=1)         # (F, n_in + F + 2)
    top = jnp.concatenate(
        [top, jnp.zeros((1, top.shape[1]), jnp.float32)], axis=0)   # (F+1, ...)
    return jnp.concatenate([top, w3a], axis=1)        # (F+1, n_in+F+2+n_out)


def _reference_forward(state, w_packed, n_input):
    F = w_packed.shape[0] - 1
    c1 = n_input + 1
    c2 = c1 + F + 1
    x = state.reshape(state.shape[0], n_input).astype(jnp.float32)
    h1 = jnp.maximum(x @ w_packed[:F, :n_input].T + w_packed[:F, n_input], 0.0)
    h2 = jnp.maximum(h1 @ w_packed[:F, c1:c1 + F].T + w_packed[:F, c1 + F], 0.0)
    return h2 @ w_packed[:F, c2:] + w_packed[F, c2:]


if __name__ == "__main__":
    key = jax.random.PRNGKey(0)
    k_param, k_state, k_state2 = jax.random.split(key, 3)

    # Pendulum-like dimensions: obs dim 3, action dim 1, hidden 32, batch 8.
    B, n_input, n_features, n_output = 8, 3, 32, 1

    params = init_actor_params(k_param, n_input, n_features, n_output)
    state = jax.random.normal(k_state, (B, 1, n_input), dtype=jnp.float32)

    out = actor_forward(state, params)
    jax.block_until_ready(out)
    ref = _reference_forward(state, params, n_input)
    assert out.shape == (B, n_output)
    assert jnp.allclose(out, ref, atol=1e-4, rtol=1e-4)

    # Also exercise the batched grid path (weights stay VMEM-resident across
    # chunks, batch padded to a multiple of the 128-lane block).
    B2 = 300
    state2 = jax.random.normal(k_state2, (B2, 1, n_input), dtype=jnp.float32)
    out2 = actor_forward(state2, params, batch_block=128)
    jax.block_until_ready(out2)
    ref2 = _reference_forward(state2, params, n_input)
    assert out2.shape == (B2, n_output)
    assert jnp.allclose(out2, ref2, atol=1e-4, rtol=1e-4)

    print("KERNEL_OK")
</pallas_src>

<mosaic_0001>
module attributes {stable_mosaic.version = 11 : i64} {
  func.func @actor_kernel(%arg0: i32, %arg1: memref<3x8xf32, #tpu.memory_space<vmem>>, %arg2: memref<33x38xf32, #tpu.memory_space<vmem>>, %arg3: memref<1x8xf32, #tpu.memory_space<vmem>>) attributes {dimension_semantics = [#tpu.dimension_semantics<parallel>], iteration_bounds = array<i64: 1>, scalar_prefetch = 0 : i64, scratch_operands = 0 : i64, tpu.core_type = #tpu.core_type<tc>, window_params = [{transform_indices = @transform_0, window_bounds = array<i64: 3, 8>}, {pipeline_mode = #tpu.pipeline_mode<synchronous>, transform_indices = @transform_1, window_bounds = array<i64: 33, 38>}, {transform_indices = @transform_2, window_bounds = array<i64: 1, 8>}]} {
    %c0 = arith.constant 0 : index
    %c0_0 = arith.constant 0 : index
    %0 = vector.load %arg1[%c0, %c0_0] : memref<3x8xf32, #tpu.memory_space<vmem>>, vector<3x8xf32>
    %c0_1 = arith.constant 0 : index
    %c0_2 = arith.constant 0 : index
    %1 = vector.load %arg2[%c0_1, %c0_2] : memref<33x38xf32, #tpu.memory_space<vmem>>, vector<33x38xf32>
    %2 = vector.extract_strided_slice %1 {offsets = [0, 0], sizes = [32, 4], strides = [1, 1]} : vector<33x38xf32> to vector<32x4xf32>
    %3 = vector.extract_strided_slice %1 {offsets = [0, 4], sizes = [32, 33], strides = [1, 1]} : vector<33x38xf32> to vector<32x33xf32>
    %4 = vector.extract_strided_slice %1 {offsets = [0, 37], sizes = [33, 1], strides = [1, 1]} : vector<33x38xf32> to vector<33x1xf32>
    %5 = vector.extract_strided_slice %2 {offsets = [0, 3], sizes = [32, 1], strides = [1, 1]} : vector<32x4xf32> to vector<32x1xf32>
    %6 = vector.extract_strided_slice %2 {offsets = [0, 0], sizes = [32, 1], strides = [1, 1]} : vector<32x4xf32> to vector<32x1xf32>
    %7 = vector.extract_strided_slice %0 {offsets = [0, 0], sizes = [1, 8], strides = [1, 1]} : vector<3x8xf32> to vector<1x8xf32>
    %8 = vector.broadcast %6 : vector<32x1xf32> to vector<32x8xf32>
    %9 = vector.broadcast %7 : vector<1x8xf32> to vector<32x8xf32>
    %10 = arith.mulf %8, %9 : vector<32x8xf32>
    %11 = vector.broadcast %5 : vector<32x1xf32> to vector<32x8xf32>
    %12 = arith.addf %11, %10 : vector<32x8xf32>
    %13 = vector.extract_strided_slice %2 {offsets = [0, 1], sizes = [32, 1], strides = [1, 1]} : vector<32x4xf32> to vector<32x1xf32>
    %14 = vector.extract_strided_slice %0 {offsets = [1, 0], sizes = [1, 8], strides = [1, 1]} : vector<3x8xf32> to vector<1x8xf32>
    %15 = vector.broadcast %13 : vector<32x1xf32> to vector<32x8xf32>
    %16 = vector.broadcast %14 : vector<1x8xf32> to vector<32x8xf32>
    %17 = arith.mulf %15, %16 : vector<32x8xf32>
    %18 = arith.addf %12, %17 : vector<32x8xf32>
    %19 = vector.extract_strided_slice %2 {offsets = [0, 2], sizes = [32, 1], strides = [1, 1]} : vector<32x4xf32> to vector<32x1xf32>
    %20 = vector.extract_strided_slice %0 {offsets = [2, 0], sizes = [1, 8], strides = [1, 1]} : vector<3x8xf32> to vector<1x8xf32>
    %21 = vector.broadcast %19 : vector<32x1xf32> to vector<32x8xf32>
    %22 = vector.broadcast %20 : vector<1x8xf32> to vector<32x8xf32>
    %23 = arith.mulf %21, %22 : vector<32x8xf32>
    %24 = arith.addf %18, %23 : vector<32x8xf32>
    %cst = arith.constant 0.000000e+00 : f32
    %25 = vector.broadcast %cst : f32 to vector<32x8xf32>
    %26 = arith.maximumf %24, %25 : vector<32x8xf32>
    %27 = vector.extract_strided_slice %3 {offsets = [0, 0], sizes = [32, 32], strides = [1, 1]} : vector<32x33xf32> to vector<32x32xf32>
    %cst_3 = arith.constant dense<0.000000e+00> : vector<32x8xf32>
    %28 = tpu.matmul %27, %26, %cst_3 {dimension_numbers = #tpu.dot_dimension_numbers<[1], [0], [0], [1], [0, 0, 1, 1], [], []>} : vector<32x32xf32>, vector<32x8xf32>, vector<32x8xf32> -> vector<32x8xf32>
    %29 = vector.extract_strided_slice %3 {offsets = [0, 32], sizes = [32, 1], strides = [1, 1]} : vector<32x33xf32> to vector<32x1xf32>
    %30 = vector.broadcast %29 : vector<32x1xf32> to vector<32x8xf32>
    %31 = arith.addf %28, %30 : vector<32x8xf32>
    %cst_4 = arith.constant 0.000000e+00 : f32
    %32 = vector.broadcast %cst_4 : f32 to vector<32x8xf32>
    %33 = arith.maximumf %31, %32 : vector<32x8xf32>
    %34 = vector.extract_strided_slice %4 {offsets = [0, 0], sizes = [32, 1], strides = [1, 1]} : vector<33x1xf32> to vector<32x1xf32>
    %35 = vector.broadcast %34 : vector<32x1xf32> to vector<32x8xf32>
    %36 = arith.mulf %35, %33 : vector<32x8xf32>
    %cst_5 = arith.constant dense<0.000000e+00> : vector<8xf32>
    %37 = vector.multi_reduction <add>, %36, %cst_5 [0] : vector<32x8xf32> to vector<8xf32>
    %38 = vector.shape_cast %37 : vector<8xf32> to vector<1x8xf32>
    %39 = vector.extract_strided_slice %4 {offsets = [32, 0], sizes = [1, 1], strides = [1, 1]} : vector<33x1xf32> to vector<1x1xf32>
    %40 = vector.broadcast %39 : vector<1x1xf32> to vector<1x8xf32>
    %41 = arith.addf %38, %40 : vector<1x8xf32>
    %c0_6 = arith.constant 0 : index
    %c0_7 = arith.constant 0 : index
    %42 = vector.load %arg3[%c0_6, %c0_7] : memref<1x8xf32, #tpu.memory_space<vmem>>, vector<1x8xf32>
    tpu.vector_store %arg3[%c0_6, %c0_7], %41 {strides = array<i32>} : memref<1x8xf32, #tpu.memory_space<vmem>>, vector<1x8xf32>,
    return
  }
  func.func @transform_0(%arg0: i32) -> (i32, i32) {
    %c0_i32 = arith.constant 0 : i32
    %c0_i32_0 = arith.constant 0 : i32
    return %c0_i32, %arg0 : i32, i32
  }
  func.func @transform_1(%arg0: i32) -> (i32, i32) {
    %c0_i32 = arith.constant 0 : i32
    %c0_i32_0 = arith.constant 0 : i32
    %c0_i32_1 = arith.constant 0 : i32
    return %c0_i32, %c0_i32_0 : i32, i32
  }
  func.func @transform_2(%arg0: i32) -> (i32, i32) {
    %c0_i32 = arith.constant 0 : i32
    %c0_i32_0 = arith.constant 0 : i32
    return %c0_i32, %arg0 : i32, i32
  }
}

</mosaic_0001>

<bundles_post_ra>
// kernel: actor_forward.1
= control target key start
LH: loop header
LB: loop body
LE: loop exit
PB: predicated region body
PF: predicated region fallthrough
CT: control target
= control target key end

     0   :  { %7 = vsyncpa [#allocation3], 0  ;;  %s487_s0 = inlined_call_operand.vmem [shape: f32[3,8], index: 0, kind: input, shape index: {}]   ;;  %s488_s1 = inlined_call_operand.hbm [shape: f32[33,38], index: 1, kind: input, shape index: {}]   ;;  %s489_s2 = inlined_call_operand.hbm [shape: f32[1,8], index: 2, kind: output, shape index: {}]  }
   0x1   :  { %8 = vsyncpa [#allocation4], 0  ;;  %s430_s9 = smov [#allocation2]   ;;  %s382_s13 = scalar_lea.hbm %s488_s1, 640 }
   0x2   :  { %s16_s10 = sshll.u32 %s430_s9, 4  ;;  %p383_p0 = scmp.ne.s32.totalorder %s488_s1, %s382_s13  ;;  %s17_s10 = int_to_ptr.vmem [resolvable:$true] %s16_s10 }
   0x3   :  { %p386_p1 = scmp.lt.u32.totalorder %s382_s13, %s488_s1 }
   0x5   :  { %p388_p2 = pnand %p386_p1, %p383_p0 }
   0x7   :  { %391 = shalt.err (!%p388_p2)
}
   0x8   :  { %s392_s18 = scalar_lea.vmem %s17_s10, 640  ;;  %p397_p4 = scmp.lt.s32.totalorder %s17_s10, %s17_s10 }
   0x9   :  { %p393_p3 = scmp.ne.s32.totalorder %s17_s10, %s392_s18  ;;  %p398_p5 = scmp.lt.s32.totalorder %s392_s18, %s392_s18 }
   0xb   :  { %p399_p6 = por %p398_p5, %p397_p4 }
   0xd   :  { %p400_p7 = pnand %p399_p6, %p393_p3 }
   0xf   :  { %403 = shalt.err (!%p400_p7)
}
  0x10   :  { %s431_s19 = smov 128   ;;  %s432_s20 = smov 8  }
  0x11   :  { %22 = dma.hbm_to_vmem [thread:$0]  %s488_s1, 640, %s17_s10, [#allocation3], %s431_s19, %s431_s19, %s432_s20  }
  0x12   :  { %426 = dma.done.wait [#allocation3], 640  }
  0x13   :  { %427 = vsyncadd [#allocation3], 4294966656  ;;  %v433_v0 = vmov 3   ;;  %v434_v1 = vmov 0   ;;  %v27_v2 = vld [vmem:[#allocation2] sm:$0xff]  ;;  %v28_v3 = vld [vmem:[#allocation2 + $0x8] sm:$0xff]  ;;  %v52_v11 = vlaneseq }
  0x14   :  { %369 = vset.pattern.permute.xlu1 %v433_v0  ;;  %368 = vset.pattern.permute.xlu0 %v434_v1  ;;  %v30_v4 = vld [vmem:[#allocation2 + $0x18] sm:$0xff]  ;;  %v435_v5 = vmov 1   ;;  %v29_v6 = vld [vmem:[#allocation2 + $0x10] sm:$0xff]  ;;  %v436_v7 = vmov 2   ;;  %s437_s1 = smov 124   ;;  %v438_v8 = vmov 36  }
  0x15   :  { %61 = vperm.xlu1 %369, %v27_v2   ;;  %34 = vperm.xlu0 %368, %v27_v2   ;;  %v439_v9 = vmov 37   ;;  %v31_v10 = vld [vmem:[#allocation2 + $0x20] sm:$0x1]  ;;  %v53_v14 = vshrl.u32 %v52_v11, 7  ;;  %vm164_vm0 = vcmask 261120   ;;  %vm282_vm1 = vcmask 64512  }
  0x16   :  { %v26_v18 = vld [vmem:[%s487_s0] sm:$0x7]  ;;  %s440_s0 = smov [#allocation5]   ;;  %vm302_vm2 = vcmask 57344  }
  0x17   :  { %v54_v17 = vsub.s32 0, %v53_v14  ;;  %v98_v22 = vsub.s32 1, %v53_v14  ;;  %v126_v23 = vsub.s32 2, %v53_v14  ;;  %s310_s25 = sshll.u32 %s440_s0, 4  ;;  %s311_s25 = int_to_ptr.vmem [resolvable:$true] %s310_s25 }
  0x18   :  { %s404_s26 = scalar_lea.vmem %s311_s25, 16  ;;  %s408_s27 = scalar_lea.vmem %s311_s25, 32 }
  0x19   :  { %65 = vperm.xlu1 %369, %v28_v3   ;;  %39 = vperm.xlu0 %368, %v28_v3   ;;  %v55_v21 = vrot.slane %v26_v18, %v54_v17  ;;  %v99_v27 = vrot.slane %v26_v18, %v98_v22  ;;  %v127_v28 = vrot.slane %v26_v18, %v126_v23  ;;  %p405_p8 = scmp.ne.s32.totalorder %s311_s25, %s404_s26  ;;  %p409_p9 = scmp.lt.s32.totalorder %s311_s25, %s311_s25 }
  0x1a   :  { %p410_p10 = scmp.lt.s32.totalorder %s408_s27, %s404_s26 }
  0x1c   :  { %p411_p11 = por %p410_p10, %p409_p9 }
  0x1d   :  { %370 = vset.pattern.permute.xlu1 %v435_v5  ;;  %49 = vperm.xlu0 %368, %v30_v4  }
  0x1e   :  { %85 = vperm.xlu1 %370, %v28_v3   ;;  %p412_p12 = pnand %p411_p11, %p405_p8 }
  0x21   :  { %373 = vset.pattern.permute.xlu0 %v433_v0 }
  0x22   :  { %371 = vset.pattern.permute.xlu1 %v434_v1  ;;  %69 = vperm.xlu0 %373, %v29_v6  }
  0x23   :  { %44 = vperm.xlu1 %371, %v29_v6  }
  0x26   :  { %374 = vset.pattern.permute.xlu0 %v435_v5 }
  0x27   :  { %372 = vset.pattern.permute.xlu1 %v436_v7  ;;  %81 = vperm.xlu0 %374, %v27_v2  }
  0x28   :  { %109 = vperm.xlu1 %372, %v27_v2  }
  0x2b   :  { %93 = vperm.xlu0 %374, %v30_v4  }
  0x2c   :  { %113 = vperm.xlu1 %372, %v28_v3  }
  0x2f   :  { %156 = vrot.lane.b32.xlu0 %v27_v2, %s437_s1 }
  0x30   :  { %375 = vset.pattern.permute.xlu1 %v433_v0  ;;  %378 = vset.pattern.permute.xlu0 %v438_v8 }
  0x31   :  { %73 = vperm.xlu1 %375, %v30_v4  }
  0x33   :  { %160 = vrot.lane.b32.xlu0 %v29_v6, %s437_s1 }
  0x35   :  { %376 = vset.pattern.permute.xlu1 %v435_v5 }
  0x36   :  { %89 = vperm.xlu1 %376, %v29_v6  }
  0x37   :  { %141 = vperm.xlu0 %378, %v27_v2  }
  0x3a   :  { %377 = vset.pattern.permute.xlu1 %v436_v7 }
  0x3b   :  { %117 = vperm.xlu1 %377, %v29_v6   ;;  %153 = vperm.xlu0 %378, %v30_v4  }
  0x3f   :  { %121 = vperm.xlu1 %377, %v30_v4   ;;  %381 = vset.pattern.permute.xlu0 %v439_v9 }
  0x40   :  { %267 = vperm.xlu0 %381, %v28_v3  }
  0x43   :  { %158 = vrot.lane.b32.xlu1 %v28_v3, %s437_s1 }
  0x44   :  { %379 = vset.pattern.permute.xlu1 %v438_v8  ;;  %298 = vperm.xlu0 %381, %v31_v10  }
  0x47   :  { %162 = vrot.lane.b32.xlu1 %v30_v4, %s437_s1 }
  0x4b   :  { %145 = vperm.xlu1 %379, %v28_v3  }
  0x4f   :  { %149 = vperm.xlu1 %379, %v29_v6  }
  0x53   :  { %380 = vset.pattern.permute.xlu1 %v439_v9 }
  0x54   :  { %263 = vperm.xlu1 %380, %v27_v2  }
  0x58   :  { %271 = vperm.xlu1 %380, %v29_v6  }
  0x5c   :  { %275 = vperm.xlu1 %380, %v30_v4  }
  0x94   :  { %v62_v12 = vpop.permute.xlu1 %61  ;;  %v35_v13 = vpop.permute.xlu0 %34 }
  0x95   :  { %v56_v26 = vmul.f32 %v55_v21, %v35_v13 }
  0x97   :  { %v76_v31 = vadd.f32 %v62_v12, %v56_v26 }
  0x98   :  { %v66_v15 = vpop.permute.xlu1 %65  ;;  %v40_v16 = vpop.permute.xlu0 %39 }
  0x99   :  { %v57_v29 = vmul.f32 %v55_v21, %v40_v16 }
  0x9b   :  { %v77_v37 = vadd.f32 %v66_v15, %v57_v29 }
  0x9c   :  { %v50_v19 = vpop.permute.xlu0 %49 }
  0x9d   :  { %v86_v20 = vpop.permute.xlu1 %85  ;;  %v59_v52 = vmul.f32 %v55_v21, %v50_v19 }
  0x9e   :  { %v101_v34 = vmul.f32 %v99_v27, %v86_v20 }
  0xa0   :  { %v105_v40 = vadd.f32 %v101_v34, %v77_v37 }
  0xa1   :  { %v70_v24 = vpop.permute.xlu0 %69 }
  0xa2   :  { %v45_v25 = vpop.permute.xlu1 %44 }
  0xa3   :  { %v58_v51 = vmul.f32 %v55_v21, %v45_v25 }
  0xa5   :  { %v78_v55 = vadd.f32 %v70_v24, %v58_v51 }
  0xa6   :  { %v82_v30 = vpop.permute.xlu0 %81 }
  0xa7   :  { %v100_v32 = vmul.f32 %v99_v27, %v82_v30  ;;  %v110_v33 = vpop.permute.xlu1 %109 }
  0xa8   :  { %v128_v35 = vmul.f32 %v127_v28, %v110_v33 }
  0xa9   :  { %v104_v36 = vadd.f32 %v100_v32, %v76_v31 }
  0xaa   :  { %v94_v38 = vpop.permute.xlu0 %93 }
  0xab   :  { %v114_v39 = vpop.permute.xlu1 %113  ;;  %v132_v41 = vadd.f32 %v128_v35, %v104_v36  ;;  %v103_v57 = vmul.f32 %v99_v27, %v94_v38 }
  0xac   :  { %v129_v42 = vmul.f32 %v127_v28, %v114_v39 }
  0xad   :  { %v136_v45 = vmax.f32 %v132_v41, 0.0 }
  0xae   :  { %v133_v43 = vadd.f32 %v129_v42, %v105_v40  ;;  %v157_v44 = vpop.permute.xlu0 %156 }
  0xaf   :  { %339 = vmatprep.mubr.msk.f32.mxu0 %vm164_vm0, %v157_v44 }
  0xb0   :  { %v137_v46 = vmax.f32 %v133_v43, 0.0  ;;  %v74_v47 = vpop.permute.xlu1 %73 }
  0xb1   :  { %v79_v56 = vadd.f32 %v74_v47, %v59_v52 }
  0xb2   :  { %v345_v48 = vpack.c.bf16 %v137_v46, %v136_v45  ;;  %v161_v49 = vpop.permute.xlu0 %160 }
  0xb3   :  { %342 = vmatprep.mubr.msk.f32.mxu1 %vm164_vm0, %v161_v49  ;;  %v107_v61 = vadd.f32 %v103_v57, %v79_v56 }
  0xb4   :  { %346 = vmatprep.subr.bf16.mxu0 %v345_v48  ;;  %353 = vmatprep.subr.bf16.mxu1 %v345_v48 }
  0xb5   :  { %v90_v50 = vpop.permute.xlu1 %89  ;;  %348 = vmatpush3.bf16.msra.mxu0 %v345_v48  ;;  %355 = vmatpush3.bf16.msra.mxu1 %v345_v48 }
  0xb6   :  { %v102_v53 = vmul.f32 %v99_v27, %v90_v50  ;;  %v142_v8 = vpop.permute.xlu0 %141 }
  0xb8   :  { %v106_v59 = vadd.f32 %v102_v53, %v78_v55 }
  0xba   :  { %v118_v54 = vpop.permute.xlu1 %117  ;;  %v154_v10 = vpop.permute.xlu0 %153 }
  0xbb   :  { %v130_v58 = vmul.f32 %v127_v28, %v118_v54 }
  0xbd   :  { %v134_v62 = vadd.f32 %v130_v58, %v106_v59 }
  0xbe   :  { %v122_v60 = vpop.permute.xlu1 %121 }
  0xbf   :  { %v131_v63 = vmul.f32 %v127_v28, %v122_v60  ;;  %v138_v2 = vmax.f32 %v134_v62, 0.0  ;;  %v268_v22 = vpop.permute.xlu0 %267 }
  0xc1   :  { %v135_v0 = vadd.f32 %v131_v63, %v107_v61 }
  0xc2   :  { %v159_v1 = vpop.permute.xlu1 %158 }
  0xc3   :  { %v139_v3 = vmax.f32 %v135_v0, 0.0  ;;  %v299_v43 = vpop.permute.xlu0 %298 }
  0xc5   :  { %v349_v4 = vpack.c.bf16 %v139_v3, %v138_v2 }
  0xc6   :  { %v163_v5 = vpop.permute.xlu1 %162 }
  0xc7   :  { %350 = vmatprep.subr.bf16.mxu0 %v349_v4  ;;  %354 = vmatprep.subr.bf16.mxu1 %v349_v4 }
  0xc8   :  { %352 = vmatpush3.bf16.msra.mxu0 %v349_v4  ;;  %356 = vmatpush3.bf16.msra.mxu1 %v349_v4 }
  0xca   :  { %v146_v6 = vpop.permute.xlu1 %145 }
  0xcb   :  { %340 = vmatmul.mubr.msk.f32.vlgmr.msra.gmra.mrb[0].mxu0 %vm164_vm0, %v159_v1  ;;  %343 = vmatmul.mubr.msk.f32.vlgmr.msra.gmra.mrb[0].mxu1 %vm164_vm0, %v163_v5 }
  0xce   :  { %v150_v7 = vpop.permute.xlu1 %149 }
  0xd3   :  { %v264_v9 = vpop.permute.xlu1 %263 }
  0xd7   :  { %v272_v11 = vpop.permute.xlu1 %271 }
  0xdb   :  { %v276_v28 = vpop.permute.xlu1 %275 }
 0x19e   :  { %v341_v12 = vpop.f32.mrb[0].mxu0  ;;  %v344_v13 = vpop.f32.mrb[0].mxu1 }
 0x19f   :  { %v245_v14 = vadd.f32 %v341_v12, %v146_v6  ;;  %v255_v15 = vadd.f32 %v344_v13, %v154_v10  ;;  %v239_v16 = vpop.f32.mrb[1].mxu0  ;;  %v249_v17 = vpop.f32.mrb[1].mxu1 }
 0x1a0   :  { %v240_v18 = vadd.f32 %v239_v16, %v142_v8  ;;  %v250_v19 = vadd.f32 %v249_v17, %v150_v7 }
 0x1a1   :  { %v259_v20 = vmax.f32 %v245_v14, 0.0  ;;  %v261_v21 = vmax.f32 %v255_v15, 0.0 }
 0x1a2   :  { %v258_v23 = vmax.f32 %v240_v18, 0.0  ;;  %v260_v24 = vmax.f32 %v250_v19, 0.0 }
 0x1a3   :  { %v279_v25 = vmul.f32 %v268_v22, %v259_v20  ;;  %v281_v30 = vmul.f32 %v276_v28, %v261_v21 }
 0x1a4   :  { %v278_v26 = vmul.f32 %v264_v9, %v258_v23  ;;  %v280_v27 = vmul.f32 %v272_v11, %v260_v24 }
 0x1a5   :  { %v284_v29 = vsel %vm282_vm1, %v279_v25, 0.0  ;;  %v288_v35 = vsel %vm282_vm1, %v281_v30, 0.0 }
 0x1a6   :  { %v283_v31 = vsel %vm282_vm1, %v278_v26, 0.0  ;;  %v286_v33 = vsel %vm282_vm1, %v280_v27, 0.0 }
 0x1a7   :  { %v285_v32 = vadd.f32 %v284_v29, %v283_v31 }
 0x1a9   :  { %v287_v34 = vadd.f32 %v286_v33, %v285_v32 }
 0x1ab   :  { %v289_v36 = vadd.f32 %v288_v35, %v287_v34 }
 0x1ad   :  { %v290_v37 = vrot.slane %v289_v36, 4 }
 0x1af   :  { %v291_v38 = vadd.f32 %v290_v37, %v289_v36 }
 0x1b1   :  { %v292_v39 = vrot.slane %v291_v38, 2 }
 0x1b3   :  { %v293_v40 = vadd.f32 %v292_v39, %v291_v38 }
 0x1b5   :  { %v294_v41 = vrot.slane %v293_v40, 1 }
 0x1b7   :  { %v295_v42 = vadd.f32 %v294_v41, %v293_v40 }
 0x1b9   :  { %v301_v44 = vadd.f32 %v299_v43, %v295_v42 }
 0x1bb   :  { %303 = vst.msk [vmem:[#allocation5] sm:$0x1] %vm302_vm2, %v301_v44 }
 0x1bc   :  { %415 = shalt.err (!%p412_p12)
}
 0x1bd   :  { %s416_s30 = scalar_lea.hbm %s489_s2, 16 }
 0x1be   :  { %p417_p13 = scmp.ne.s32.totalorder %s489_s2, %s416_s30  ;;  %p420_p0 = scmp.lt.u32.totalorder %s416_s30, %s489_s2 }
 0x1c0   :  { %p422_p1 = pnand %p420_p0, %p417_p13 }
 0x1c2   :  { %425 = shalt.err (!%p422_p1)
}
 0x1c3   :  { %313 = dma.vmem_to_hbm [thread:$0]  %s311_s25, 16, %s489_s2, [#allocation4]  }
 0x1c4   :  { %428 = dma.done.wait [#allocation4], 16  }
 0x1c5   :  { %429 = vsyncadd [#allocation4], 4294967280 }
 0x1c6   :  { %317 = vsyncpa [#allocation3], 1 }
 0x1c7   :  { %318 = vsyncpa [#allocation4], 1 }

</bundles_post_ra>
